<compile_context>
chip_gen: v7x
topology: tpu7x:2x2x1
jax: 0.10.0
libtpu: 0.0.40
codegen_flags: <defaults>
</compile_context>

<pallas_src>
import jax
import jax.numpy as jnp
from jax.experimental import pallas as pl
from jax.experimental.pallas import tpu as pltpu


# ----------------------------------------------------------------------------
# Kernel: o = clip(x * mul, lo, hi) with per-row (mul, lo, hi) columns.
# Un-applied rows carry (mul=1, lo=-inf, hi=+inf) -> exact identity.
# ----------------------------------------------------------------------------
def _contrast_kernel(mul_ref, lo_ref, hi_ref, x_ref, o_ref):
    x = x_ref[...].astype(jnp.float32)                      # upcast in-register
    y = jnp.clip(x * mul_ref[...], lo_ref[...], hi_ref[...])  # (TP,1) broadcast vs (TP,L)
    o_ref[...] = y.astype(o_ref.dtype)                      # downcast, single store


# ----------------------------------------------------------------------------
# Layout helpers
# ----------------------------------------------------------------------------
def _pick_lane(per_sample):
    """Largest lane width (multiple of 128) dividing per_sample; 128 -> padded path."""
    for cand in (2048, 1024, 512, 256, 128):
        if per_sample % cand == 0:
            return cand
    return 128  # per-sample size not a multiple of 128: pad each sample up to 128*k


def _pick_row_tile(num_rows, lane, itemsize):
    """Largest legal row tile with block bytes <= ~2 MiB, preferring >= 256 KiB blocks
    (amortize ~0.35us/grid-step overhead) and >= 2 grid steps (v7x has 2 TensorCores
    sharing the 'parallel' grid axis)."""
    sub = max(8, 32 // itemsize)        # sublane alignment: 8 (f32) / 16 (bf16) / 32 (i8)
    cap = 2 * 1024 * 1024               # per-block cap: v5e 16 MiB scoped-VMEM safe
    floor = 256 * 1024
    row_bytes = lane * itemsize

    divs = set()
    i = 1
    while i * i <= num_rows:
        if num_rows % i == 0:
            divs.add(i)
            divs.add(num_rows // i)
        i += 1
    aligned = [d for d in sorted(divs) if d % sub == 0 or d == num_rows]

    legal = [d for d in aligned if d * row_bytes <= cap]
    if not legal:                       # every legal tile exceeds the cap: take smallest
        return min(aligned, key=lambda d: d * row_bytes)

    def score(d):
        b = d * row_bytes
        return (b >= floor, (num_rows // d) >= 2, b)

    return max(legal, key=score)


# ----------------------------------------------------------------------------
# Wrapper: KorniaRandomContrast forward
# ----------------------------------------------------------------------------
def kornia_random_contrast(t, key, *, contrast=(0.8, 1.2), p=1.0, in_place=False):
    """t: tuple whose first element is an (N, C, H, W) float image batch in [0, 1]."""
    x = t[0]
    if not jnp.issubdtype(x.dtype, jnp.floating):
        raise TypeError(
            f"KorniaRandomContrast expects a floating image tensor in [0,1]; got {x.dtype}. "
            "(kornia.RandomContrast has the same precondition)")

    N = x.shape[0]
    per_sample = 1
    for d in x.shape[1:]:
        per_sample *= d
    itemsize = jnp.dtype(x.dtype).itemsize

    # Per-sample augmentation parameters (kornia samples these with torch RNG at call
    # time; here they are drawn from the provided JAX key).
    kf, ka = jax.random.split(key, 2)
    apply_flag = jax.random.uniform(ka, (N,)) < p
    factors = jax.random.uniform(
        kf, (N,), minval=contrast[0], maxval=contrast[1]).astype(jnp.float32)
    inf = jnp.float32(jnp.inf)
    mul = jnp.where(apply_flag, factors, jnp.float32(1.0))
    lo = jnp.where(apply_flag, jnp.float32(0.0), -inf)   # identity clip when not applied
    hi = jnp.where(apply_flag, jnp.float32(1.0), inf)

    # Lane-dense flattened layout: (N, per_sample) -> (R, L), L a multiple of 128.
    L = _pick_lane(per_sample)
    padded = -(-per_sample // L) * L
    rows_per_sample = padded // L
    R = N * rows_per_sample

    xf = x.reshape(N, per_sample)
    if padded != per_sample:
        xf = jnp.pad(xf, ((0, 0), (0, padded - per_sample)))
    x2 = xf.reshape(R, L)

    mul_r = jnp.repeat(mul, rows_per_sample).reshape(R, 1)
    lo_r = jnp.repeat(lo, rows_per_sample).reshape(R, 1)
    hi_r = jnp.repeat(hi, rows_per_sample).reshape(R, 1)

    TP = _pick_row_tile(R, L, itemsize)
    grid = (R // TP,)

    img = pl.BlockSpec((TP, L), lambda i: (i, 0))
    col = pl.BlockSpec((TP, 1), lambda i: (i, 0))

    out2 = pl.pallas_call(
        _contrast_kernel,
        out_shape=jax.ShapeDtypeStruct((R, L), x.dtype),
        grid=grid,
        in_specs=[col, col, col, img],
        out_specs=img,
        input_output_aliases=({3: 0} if in_place else {}),
        compiler_params=pltpu.CompilerParams(
            dimension_semantics=("parallel",)),
    )(mul_r, lo_r, hi_r, x2)

    out = out2.reshape(N, padded)
    if padded != per_sample:
        out = out[:, :per_sample]
    x_out = out.reshape(x.shape)

    # TODO(synk): only kornia's default flags (clip_output=True, same_on_batch=False)
    # are implemented; torch-RNG-exact parameter reproduction is not possible in JAX.
    # TODO(synk): for p << 1, a PrefetchScalarGridSpec grid over a compacted list of
    # applied samples (with in_place=True) would scale HBM traffic by ~p.
    l = list(t)
    l[0] = x_out
    return tuple(l)


# ----------------------------------------------------------------------------
# Example / self-test
# ----------------------------------------------------------------------------
if __name__ == "__main__":
    key = jax.random.PRNGKey(0)
    kx, ky, kaug = jax.random.split(key, 3)

    N, C, H, W = 2, 4, 16, 16
    x = jax.random.uniform(kx, (N, C, H, W), dtype=jnp.float32)
    y = (jax.random.uniform(ky, (N, C, H, W)) > 0.5).astype(jnp.float32)  # passthrough

    contrast = (0.8, 1.2)
    p = 0.75

    # Pure-JAX reference (same parameter draws as the wrapper).
    kf, ka = jax.random.split(kaug, 2)
    apply_flag = jax.random.uniform(ka, (N,)) < p
    factors = jax.random.uniform(
        kf, (N,), minval=contrast[0], maxval=contrast[1]).astype(jnp.float32)
    f4 = factors[:, None, None, None]
    a4 = apply_flag[:, None, None, None]
    ref = jnp.where(a4, jnp.clip(x * f4, 0.0, 1.0), x)

    # f32 path (per_sample = 1024, already lane-dense).
    out = kornia_random_contrast((x, y), kaug, contrast=contrast, p=p)
    jax.block_until_ready(out)
    assert out[0].shape == x.shape and out[0].dtype == x.dtype
    assert bool(jnp.array_equal(out[1], y))                 # passthrough untouched
    assert bool(jnp.allclose(out[0], ref, atol=1e-6))

    # bf16 path: native-dtype HBM traffic, up/down-cast inside the kernel.
    xb = x.astype(jnp.bfloat16)
    outb = kornia_random_contrast((xb, y), kaug, contrast=contrast, p=p)
    jax.block_until_ready(outb)
    refb = jnp.where(a4, jnp.clip(xb.astype(jnp.float32) * f4, 0.0, 1.0),
                     xb.astype(jnp.float32)).astype(jnp.bfloat16)
    assert outb[0].dtype == jnp.bfloat16
    assert bool(jnp.allclose(outb[0].astype(jnp.float32),
                             refb.astype(jnp.float32), atol=1e-2))

    # Non-128-divisible per-sample size exercises the padded lane-dense path.
    N2, C2, H2, W2 = 2, 3, 10, 10   # per_sample = 300
    x2 = jax.random.uniform(kx, (N2, C2, H2, W2), dtype=jnp.float32)
    out2 = kornia_random_contrast((x2,), kaug, contrast=contrast, p=p)
    jax.block_until_ready(out2)
    ref2 = jnp.where(a4[:N2], jnp.clip(x2 * f4[:N2], 0.0, 1.0), x2)
    assert bool(jnp.allclose(out2[0], ref2, atol=1e-6))

    print("KERNEL_OK")
</pallas_src>

<mosaic_0001>
module attributes {stable_mosaic.version = 11 : i64} {
  func.func @_contrast_kernel(%arg0: i32, %arg1: memref<2x1xf32, #tpu.memory_space<vmem>>, %arg2: memref<2x1xf32, #tpu.memory_space<vmem>>, %arg3: memref<2x1xf32, #tpu.memory_space<vmem>>, %arg4: memref<2x1024xf32, #tpu.memory_space<vmem>>, %arg5: memref<2x1024xf32, #tpu.memory_space<vmem>>) attributes {dimension_semantics = [#tpu.dimension_semantics<parallel>], iteration_bounds = array<i64: 1>, scalar_prefetch = 0 : i64, scratch_operands = 0 : i64, tpu.core_type = #tpu.core_type<tc>, window_params = [{transform_indices = @transform_0, window_bounds = array<i64: 2, 1>}, {transform_indices = @transform_1, window_bounds = array<i64: 2, 1>}, {transform_indices = @transform_2, window_bounds = array<i64: 2, 1>}, {transform_indices = @transform_3, window_bounds = array<i64: 2, 1024>}, {transform_indices = @transform_4, window_bounds = array<i64: 2, 1024>}]} {
    %c0 = arith.constant 0 : index
    %c0_0 = arith.constant 0 : index
    %0 = vector.load %arg4[%c0, %c0_0] : memref<2x1024xf32, #tpu.memory_space<vmem>>, vector<2x1024xf32>
    %c0_1 = arith.constant 0 : index
    %c0_2 = arith.constant 0 : index
    %1 = vector.load %arg1[%c0_1, %c0_2] : memref<2x1xf32, #tpu.memory_space<vmem>>, vector<2x1xf32>
    %2 = vector.broadcast %1 : vector<2x1xf32> to vector<2x1024xf32>
    %3 = arith.mulf %0, %2 : vector<2x1024xf32>
    %c0_3 = arith.constant 0 : index
    %c0_4 = arith.constant 0 : index
    %4 = vector.load %arg2[%c0_3, %c0_4] : memref<2x1xf32, #tpu.memory_space<vmem>>, vector<2x1xf32>
    %c0_5 = arith.constant 0 : index
    %c0_6 = arith.constant 0 : index
    %5 = vector.load %arg3[%c0_5, %c0_6] : memref<2x1xf32, #tpu.memory_space<vmem>>, vector<2x1xf32>
    %6 = vector.broadcast %4 : vector<2x1xf32> to vector<2x1024xf32>
    %7 = arith.maximumf %6, %3 : vector<2x1024xf32>
    %8 = vector.broadcast %5 : vector<2x1xf32> to vector<2x1024xf32>
    %9 = arith.minimumf %8, %7 : vector<2x1024xf32>
    %c0_7 = arith.constant 0 : index
    %c0_8 = arith.constant 0 : index
    %10 = vector.load %arg5[%c0_7, %c0_8] : memref<2x1024xf32, #tpu.memory_space<vmem>>, vector<2x1024xf32>
    tpu.vector_store %arg5[%c0_7, %c0_8], %9 {strides = array<i32>} : memref<2x1024xf32, #tpu.memory_space<vmem>>, vector<2x1024xf32>,
    return
  }
  func.func @transform_0(%arg0: i32) -> (i32, i32) {
    %c0_i32 = arith.constant 0 : i32
    %c0_i32_0 = arith.constant 0 : i32
    return %arg0, %c0_i32 : i32, i32
  }
  func.func @transform_1(%arg0: i32) -> (i32, i32) {
    %c0_i32 = arith.constant 0 : i32
    %c0_i32_0 = arith.constant 0 : i32
    return %arg0, %c0_i32 : i32, i32
  }
  func.func @transform_2(%arg0: i32) -> (i32, i32) {
    %c0_i32 = arith.constant 0 : i32
    %c0_i32_0 = arith.constant 0 : i32
    return %arg0, %c0_i32 : i32, i32
  }
  func.func @transform_3(%arg0: i32) -> (i32, i32) {
    %c0_i32 = arith.constant 0 : i32
    %c0_i32_0 = arith.constant 0 : i32
    return %arg0, %c0_i32 : i32, i32
  }
  func.func @transform_4(%arg0: i32) -> (i32, i32) {
    %c0_i32 = arith.constant 0 : i32
    %c0_i32_0 = arith.constant 0 : i32
    return %arg0, %c0_i32 : i32, i32
  }
}

</mosaic_0001>

<bundles_post_ra>
// kernel: tpu_custom_call.1
= control target key start
LH: loop header
LB: loop body
LE: loop exit
PB: predicated region body
PF: predicated region fallthrough
CT: control target
= control target key end

     0   :  { %v197_v1 = vmov 0   ;;  %s253_s0 = inlined_call_operand.vmem [shape: f32[2,1], index: 0, kind: input, shape index: {}]   ;;  %s254_s1 = inlined_call_operand.vmem [shape: f32[2,1], index: 1, kind: input, shape index: {}]   ;;  %s255_s2 = inlined_call_operand.vmem [shape: f32[2,1], index: 2, kind: input, shape index: {}]   ;;  %s256_s3 = inlined_call_operand.vmem [shape: f32[2,1024], index: 3, kind: input, shape index: {}]   ;;  %s257_s4 = inlined_call_operand.hbm [shape: f32[2,1024], index: 4, kind: output, shape index: {}]  }
   0x1   :  { %v20_v0 = vld [vmem:[%s253_s0] sm:$0x3]  ;;  %171 = vset.pattern.permute.xlu0 %v197_v1  ;;  %172 = vset.pattern.permute.xlu1 %v197_v1 }
   0x2   :  { %v36_v2 = vld [vmem:[%s255_s2] sm:$0x3]  ;;  %23 = vperm.xlu0 %171, %v20_v0  }
   0x3   :  { %96 = vperm.xlu1 %172, %v36_v2  }
   0x4   :  { %9 = vsyncpa [#allocation3], 0  ;;  %v35_v3 = vld [vmem:[%s254_s1] sm:$0x3]  ;;  %v198_v4 = vmov 269488144   ;;  %v28_v6 = vlaneseq }
   0x5   :  { %v26_v5 = vunpack.c.l.s4 %v198_v4  ;;  %v199_v9 = vmov 1983009808   ;;  %v18_v14 = vld [vmem:[%s256_s3] sm:$0xff]  ;;  %v19_v15 = vld [vmem:[%s256_s3 + $0x8] sm:$0xff]  ;;  %s200_s1 = smov [#allocation2]  }
   0x6   :  { %39 = vperm.xlu0 %171, %v35_v3   ;;  %v29_v8 = vshrl.u32 %v28_v6, 7  ;;  %v46_v10 = vunpack.c.l.s4 %v199_v9  ;;  %s159_s3 = sshll.u32 %s200_s1, 4  ;;  %s160_s3 = int_to_ptr.vmem [resolvable:$true] %s159_s3 }
   0x7   :  { %v27_v7 = vunpack.c.0.s8 %v26_v5  ;;  %s173_s23 = scalar_lea.vmem %s160_s3, 256  ;;  %p178_p1 = scmp.lt.s32.totalorder %s160_s3, %s160_s3 }
   0x8   :  { %v47_v12 = vunpack.c.0.s8 %v46_v10  ;;  %p174_p0 = scmp.ne.s32.totalorder %s160_s3, %s173_s23  ;;  %p179_p2 = scmp.lt.s32.totalorder %s173_s23, %s173_s23 }
   0x9   :  { %v30_v11 = vsub.s32 %v27_v7, %v29_v8 }
   0xa   :  { %v50_v16 = vsub.s32 %v47_v12, %v29_v8  ;;  %p180_p3 = por %p179_p2, %p178_p1 }
   0xc   :  { %p181_p4 = pnand %p180_p3, %p174_p0 }
  0x81   :  { %v24_v13 = vpop.permute.xlu0 %23 }
  0x82   :  { %v31_v17 = vrot.slane %v24_v13, %v30_v11  ;;  %v97_v29 = vpop.permute.xlu1 %96 }
  0x84   :  { %v33_v18 = vmul.f32 %v31_v17, %v18_v14  ;;  %v34_v19 = vmul.f32 %v31_v17, %v19_v15 }
  0x85   :  { %v40_v28 = vpop.permute.xlu0 %39 }
  0x86   :  { %v44_v20 = vcombine.high %v33_v18, %v33_v18  ;;  %v51_v21 = vrot.slane %v33_v18, %v50_v16  ;;  %v61_v22 = vcombine.high %v34_v19, %v34_v19  ;;  %v68_v23 = vrot.slane %v34_v19, %v50_v16 }
  0x88   :  { %v58_v24 = vrot.slane %v44_v20, %v50_v16  ;;  %v59_v25 = vcombine.high %v51_v21, %v51_v21  ;;  %v75_v26 = vrot.slane %v61_v22, %v50_v16  ;;  %v76_v27 = vcombine.high %v68_v23, %v68_v23 }
  0x89   :  { %v86_v30 = vmax.f32 %v40_v28, %v51_v21  ;;  %v90_v31 = vmax.f32 %v40_v28, %v68_v23 }
  0x8a   :  { %v60_v32 = vcombine.high %v58_v24, %v58_v24  ;;  %v77_v33 = vcombine.high %v75_v26, %v75_v26  ;;  %v87_v34 = vmax.f32 %v40_v28, %v59_v25  ;;  %v88_v35 = vmax.f32 %v40_v28, %v58_v24 }
  0x8b   :  { %v91_v36 = vmax.f32 %v40_v28, %v76_v27  ;;  %v92_v37 = vmax.f32 %v40_v28, %v75_v26  ;;  %v99_v40 = vmin.f32 %v97_v29, %v86_v30  ;;  %v103_v43 = vmin.f32 %v97_v29, %v90_v31 }
  0x8c   :  { %v89_v38 = vmax.f32 %v40_v28, %v60_v32  ;;  %v93_v39 = vmax.f32 %v40_v28, %v77_v33  ;;  %v100_v41 = vmin.f32 %v97_v29, %v87_v34  ;;  %v101_v42 = vmin.f32 %v97_v29, %v88_v35 }
  0x8d   :  { %v104_v44 = vmin.f32 %v97_v29, %v91_v36  ;;  %v105_v46 = vmin.f32 %v97_v29, %v92_v37 }
  0x8e   :  { %v102_v45 = vmin.f32 %v97_v29, %v89_v38  ;;  %v106_v47 = vmin.f32 %v97_v29, %v93_v39  ;;  %v115_v48 = vcombine.low %v99_v40, %v100_v41 }
  0x8f   :  { %v132_v49 = vcombine.low %v103_v43, %v104_v44 }
  0x90   :  { %v116_v50 = vcombine.low %v101_v42, %v102_v45  ;;  %v133_v51 = vcombine.low %v105_v46, %v106_v47  ;;  %v123_v52 = vrot.slane %v115_v48, %v50_v16 }
  0x91   :  { %v140_v54 = vrot.slane %v132_v49, %v50_v16 }
  0x92   :  { %v130_v53 = vrot.slane %v116_v50, %v50_v16  ;;  %v147_v55 = vrot.slane %v133_v51, %v50_v16 }
  0x94   :  { %v131_v56 = vcombine.low %v123_v52, %v130_v53  ;;  %v148_v57 = vcombine.low %v140_v54, %v147_v55 }
  0x96   :  { %151 = vst [vmem:[#allocation2] sm:$0xff] %v131_v56  ;;  %152 = vst [vmem:[#allocation2 + $0x8] sm:$0xff] %v148_v57 }
  0x97   :  { %184 = shalt.err (!%p181_p4)
}
  0x98   :  { %s185_s26 = scalar_lea.hbm %s257_s4, 256 }
  0x99   :  { %p186_p5 = scmp.ne.s32.totalorder %s257_s4, %s185_s26  ;;  %p189_p6 = scmp.lt.u32.totalorder %s185_s26, %s257_s4 }
  0x9b   :  { %p191_p7 = pnand %p189_p6, %p186_p5 }
  0x9d   :  { %194 = shalt.err (!%p191_p7)
}
  0x9e   :  { %162 = dma.vmem_to_hbm [thread:$0]  %s160_s3, 256, %s257_s4, [#allocation3]  }
  0x9f   :  { %195 = dma.done.wait [#allocation3], 256  }
  0xa0   :  { %196 = vsyncadd [#allocation3], 4294967040 }
  0xa1   :  { %166 = vsyncpa [#allocation3], 1 }

</bundles_post_ra>
